<compile_context>
chip_gen: v6e
topology: v6e:2x2x1
jax: 0.10.0
libtpu: 0.0.40
codegen_flags: <defaults>
</compile_context>

<pallas_src>
import functools

import jax
import jax.numpy as jnp
from jax.experimental import pallas as pl
from jax.experimental.pallas import tpu as pltpu


def _round_up(a, b):
    return ((a + b - 1) // b) * b


def _poly2d_kernel(coef_ref, x_ref, y_ref, out_ref, *, degree_x, degree_y,
                   use_mxu):
    x = x_ref[...]            # (tile_h, 1)  row coordinate (varies along sublanes)
    y = y_ref[...]            # (1, tile_w)  col coordinate (varies along lanes)
    ncy = degree_y + 1
    nx = degree_x + 1

    # Inner Horner over y on the cheap (1, tile_w) row:
    #   row_polys[p](y) = sum_q c[p*ncy + q] * y**q
    row_polys = []
    for p in range(nx):
        base = p * ncy
        acc = jnp.full_like(y, coef_ref[base + degree_y])   # scalar SMEM read
        for q in range(degree_y - 1, -1, -1):
            acc = acc * y + coef_ref[base + q]
        row_polys.append(acc)

    if use_mxu and degree_x >= 1:
        # Rank-nx combine on the (otherwise idle) MXU:
        #   out = X_pow @ RowPoly, X_pow[:, p] = x**p, RowPoly[p, :] = row_polys[p].
        # K is zero-padded to a sublane-friendly multiple of 8.
        kpad = _round_up(nx, 8)
        x_pows = [jnp.ones_like(x)]
        for _ in range(degree_x):
            x_pows.append(x_pows[-1] * x)
        x_pows += [jnp.zeros_like(x)] * (kpad - nx)
        xp = jnp.concatenate(x_pows, axis=1)                      # (tile_h, kpad)
        rp = jnp.concatenate(
            row_polys + [jnp.zeros_like(y)] * (kpad - nx), axis=0)  # (kpad, tile_w)
        out = jnp.dot(xp, rp, preferred_element_type=jnp.float32)
    else:
        # Outer Horner over x on the full tile: 2 VALU ops per element per step.
        xb = jnp.broadcast_to(x, out_ref.shape)   # hoisted: broadcast exactly once
        out = jnp.broadcast_to(row_polys[degree_x], out_ref.shape)
        for p in range(degree_x - 1, -1, -1):
            out = out * xb + row_polys[p]

    out_ref[...] = out.astype(out_ref.dtype)


def polynomial2d_forward(coeffs, x_vec, y_vec, degree_x, degree_y,
                         tile_h=512, tile_w=2048, out_dtype=jnp.float32,
                         use_mxu=None):
    """Evaluate the 2-D polynomial on the separable grid x_vec (H,), y_vec (W,)."""
    H = int(x_vec.shape[0])
    W = int(y_vec.shape[0])
    if use_mxu is None:
        # At degree_x >= 3 the VPU combine becomes the binding unit on v7x;
        # the MXU path is harmless (idle unit) elsewhere.
        use_mxu = degree_x >= 3

    # Clamp tiles to the problem size, keeping (8, 128) alignment.
    tile_h = min(tile_h, _round_up(H, 8))
    tile_w = min(tile_w, _round_up(W, 128))
    # Keep >= 2 blocks along one "parallel" axis so both v7x TensorCores get work.
    if pl.cdiv(H, tile_h) == 1 and pl.cdiv(W, tile_w) == 1:
        if H > 8:
            tile_h = _round_up(pl.cdiv(H, 2), 8)
        elif W > 128:
            tile_w = _round_up(pl.cdiv(W, 2), 128)

    grid = (pl.cdiv(H, tile_h), pl.cdiv(W, tile_w))   # ragged edges masked by Pallas

    coeffs = coeffs.astype(jnp.float32)
    x_col = x_vec.astype(jnp.float32).reshape(H, 1)
    y_row = y_vec.astype(jnp.float32).reshape(1, W)

    kernel = functools.partial(
        _poly2d_kernel, degree_x=degree_x, degree_y=degree_y, use_mxu=use_mxu)

    out_itemsize = jnp.dtype(out_dtype).itemsize
    out_tile_bytes = tile_h * tile_w * out_itemsize
    # 2x double-buffered output tile + in-kernel temporaries + headroom,
    # capped at v7x's 64 MiB physical VMEM.
    vmem_limit = int(min(64 << 20, max(32 << 20, 6 * out_tile_bytes)))

    cost = pl.CostEstimate(
        flops=2 * H * W * max(degree_x, 1) + 2 * W * degree_y * (degree_x + 1),
        transcendentals=0,
        bytes_accessed=H * W * out_itemsize + 4 * (H + W + int(coeffs.shape[0])),
    )

    return pl.pallas_call(
        kernel,
        out_shape=jax.ShapeDtypeStruct((H, W), out_dtype),
        grid=grid,
        in_specs=[
            # Flat coefficient vector lives in SMEM (tiny, copied once).
            pl.BlockSpec(memory_space=pltpu.MemorySpace.SMEM),
            pl.BlockSpec((tile_h, 1), lambda i, j: (i, 0)),
            pl.BlockSpec((1, tile_w), lambda i, j: (0, j)),
        ],
        out_specs=pl.BlockSpec((tile_h, tile_w), lambda i, j: (i, j)),
        compiler_params=pltpu.CompilerParams(
            dimension_semantics=("parallel", "parallel"),
            vmem_limit_bytes=vmem_limit),
        cost_estimate=cost,
    )(coeffs, x_col, y_row)


def polynomial2d_ref(coeffs, x, y, degree_x, degree_y):
    """Pure-JAX reference mirroring the PyTorch forward double loop."""
    out = jnp.zeros_like(x)
    idx = 0
    for i in range(degree_x + 1):
        for j in range(degree_y + 1):
            out = out + coeffs[idx] * (x ** i) * (y ** j)
            idx += 1
    return out


if __name__ == "__main__":
    key = jax.random.PRNGKey(0)

    def run_case(degree_x, degree_y, H, W, use_mxu):
        n_coef = (degree_x + 1) * (degree_y + 1)
        case_key = jax.random.fold_in(key, degree_x * 17 + degree_y)
        # Deterministic stand-in for the nn.Parameter(torch.randn(1)) list.
        coeffs = jax.random.normal(case_key, (n_coef,), dtype=jnp.float32)

        # Normalized coordinates exactly like Polynomial2DModel.__init__ (separable).
        x_vec = (jnp.arange(H, dtype=jnp.float32) - H // 2) / (H // 2)
        y_vec = (jnp.arange(W, dtype=jnp.float32) - W // 2) / (W // 2)

        out = polynomial2d_forward(coeffs, x_vec, y_vec, degree_x, degree_y,
                                   use_mxu=use_mxu)
        out = jax.block_until_ready(out)

        x_full, y_full = jnp.meshgrid(x_vec, y_vec, indexing="ij")
        ref = polynomial2d_ref(coeffs, x_full, y_full, degree_x, degree_y)

        assert out.shape == (H, W) and out.dtype == jnp.float32
        assert jnp.allclose(out, ref, atol=1e-4, rtol=1e-4), (
            f"mismatch vs reference (dx={degree_x}, dy={degree_y}, "
            f"H={H}, W={W}, use_mxu={use_mxu})")

    # MXU-combine path (degree_x >= 3) on a ragged (non-tile-aligned) grid,
    # exercising the masked edge-block writeback and the 2-block grid split.
    run_case(degree_x=3, degree_y=2, H=300, W=700, use_mxu=None)
    # Horner (VPU) path on an aligned grid.
    run_case(degree_x=2, degree_y=3, H=256, W=512, use_mxu=False)

    print("KERNEL_OK")
</pallas_src>

<mosaic_0001>
module attributes {stable_mosaic.version = 11 : i64} {
  func.func @_poly2d_kernel(%arg0: i32, %arg1: i32, %arg2: memref<12xf32, #tpu.memory_space<smem>>, %arg3: memref<152x1xf32, #tpu.memory_space<vmem>>, %arg4: memref<1x768xf32, #tpu.memory_space<vmem>>, %arg5: memref<152x768xf32, #tpu.memory_space<vmem>>) attributes {dimension_semantics = [#tpu.dimension_semantics<parallel>, #tpu.dimension_semantics<parallel>], iteration_bounds = array<i64: 2, 1>, scalar_prefetch = 0 : i64, scratch_operands = 0 : i64, tpu.core_type = #tpu.core_type<tc>, window_params = [{transform_indices = @transform_0, window_bounds = array<i64: 12>}, {transform_indices = @transform_1, window_bounds = array<i64: 152, 1>}, {transform_indices = @transform_2, window_bounds = array<i64: 1, 768>}, {transform_indices = @transform_3, window_bounds = array<i64: 152, 768>}]} {
    %c0 = arith.constant 0 : index
    %c0_0 = arith.constant 0 : index
    %0 = vector.load %arg3[%c0, %c0_0] : memref<152x1xf32, #tpu.memory_space<vmem>>, vector<152x1xf32>
    %c0_1 = arith.constant 0 : index
    %c0_2 = arith.constant 0 : index
    %1 = vector.load %arg4[%c0_1, %c0_2] : memref<1x768xf32, #tpu.memory_space<vmem>>, vector<1x768xf32>
    %c2 = arith.constant 2 : index
    %2 = memref.load %arg2[%c2] : memref<12xf32, #tpu.memory_space<smem>>
    %3 = vector.broadcast %2 : f32 to vector<1x768xf32>
    %4 = arith.mulf %3, %1 : vector<1x768xf32>
    %c1 = arith.constant 1 : index
    %5 = memref.load %arg2[%c1] : memref<12xf32, #tpu.memory_space<smem>>
    %6 = vector.broadcast %5 : f32 to vector<1x768xf32>
    %7 = arith.addf %4, %6 : vector<1x768xf32>
    %8 = arith.mulf %7, %1 : vector<1x768xf32>
    %c0_3 = arith.constant 0 : index
    %9 = memref.load %arg2[%c0_3] : memref<12xf32, #tpu.memory_space<smem>>
    %10 = vector.broadcast %9 : f32 to vector<1x768xf32>
    %11 = arith.addf %8, %10 : vector<1x768xf32>
    %c5 = arith.constant 5 : index
    %12 = memref.load %arg2[%c5] : memref<12xf32, #tpu.memory_space<smem>>
    %13 = vector.broadcast %12 : f32 to vector<1x768xf32>
    %14 = arith.mulf %13, %1 : vector<1x768xf32>
    %c4 = arith.constant 4 : index
    %15 = memref.load %arg2[%c4] : memref<12xf32, #tpu.memory_space<smem>>
    %16 = vector.broadcast %15 : f32 to vector<1x768xf32>
    %17 = arith.addf %14, %16 : vector<1x768xf32>
    %18 = arith.mulf %17, %1 : vector<1x768xf32>
    %c3 = arith.constant 3 : index
    %19 = memref.load %arg2[%c3] : memref<12xf32, #tpu.memory_space<smem>>
    %20 = vector.broadcast %19 : f32 to vector<1x768xf32>
    %21 = arith.addf %18, %20 : vector<1x768xf32>
    %c8 = arith.constant 8 : index
    %22 = memref.load %arg2[%c8] : memref<12xf32, #tpu.memory_space<smem>>
    %23 = vector.broadcast %22 : f32 to vector<1x768xf32>
    %24 = arith.mulf %23, %1 : vector<1x768xf32>
    %c7 = arith.constant 7 : index
    %25 = memref.load %arg2[%c7] : memref<12xf32, #tpu.memory_space<smem>>
    %26 = vector.broadcast %25 : f32 to vector<1x768xf32>
    %27 = arith.addf %24, %26 : vector<1x768xf32>
    %28 = arith.mulf %27, %1 : vector<1x768xf32>
    %c6 = arith.constant 6 : index
    %29 = memref.load %arg2[%c6] : memref<12xf32, #tpu.memory_space<smem>>
    %30 = vector.broadcast %29 : f32 to vector<1x768xf32>
    %31 = arith.addf %28, %30 : vector<1x768xf32>
    %c11 = arith.constant 11 : index
    %32 = memref.load %arg2[%c11] : memref<12xf32, #tpu.memory_space<smem>>
    %33 = vector.broadcast %32 : f32 to vector<1x768xf32>
    %34 = arith.mulf %33, %1 : vector<1x768xf32>
    %c10 = arith.constant 10 : index
    %35 = memref.load %arg2[%c10] : memref<12xf32, #tpu.memory_space<smem>>
    %36 = vector.broadcast %35 : f32 to vector<1x768xf32>
    %37 = arith.addf %34, %36 : vector<1x768xf32>
    %38 = arith.mulf %37, %1 : vector<1x768xf32>
    %c9 = arith.constant 9 : index
    %39 = memref.load %arg2[%c9] : memref<12xf32, #tpu.memory_space<smem>>
    %40 = vector.broadcast %39 : f32 to vector<1x768xf32>
    %41 = arith.addf %38, %40 : vector<1x768xf32>
    %cst = arith.constant 1.000000e+00 : f32
    %42 = vector.broadcast %cst : f32 to vector<152x1xf32>
    %43 = arith.mulf %42, %0 : vector<152x1xf32>
    %44 = arith.mulf %43, %0 : vector<152x1xf32>
    %45 = arith.mulf %44, %0 : vector<152x1xf32>
    %cst_4 = arith.constant 0.000000e+00 : f32
    %46 = vector.broadcast %cst_4 : f32 to vector<152x1xf32>
    %47 = tpu.concatenate %42, %43, %44, %45, %46, %46, %46, %46 in 1 : vector<152x1xf32>, vector<152x1xf32>, vector<152x1xf32>, vector<152x1xf32>, vector<152x1xf32>, vector<152x1xf32>, vector<152x1xf32>, vector<152x1xf32> -> vector<152x8xf32>
    %cst_5 = arith.constant 0.000000e+00 : f32
    %48 = vector.broadcast %cst_5 : f32 to vector<1x768xf32>
    %49 = tpu.concatenate %11, %21, %31, %41, %48, %48, %48, %48 in 0 : vector<1x768xf32>, vector<1x768xf32>, vector<1x768xf32>, vector<1x768xf32>, vector<1x768xf32>, vector<1x768xf32>, vector<1x768xf32>, vector<1x768xf32> -> vector<8x768xf32>
    %cst_6 = arith.constant dense<0.000000e+00> : vector<152x768xf32>
    %50 = tpu.matmul %47, %49, %cst_6 {dimension_numbers = #tpu.dot_dimension_numbers<[1], [0], [0], [1], [0, 0, 1, 1], [], []>} : vector<152x8xf32>, vector<8x768xf32>, vector<152x768xf32> -> vector<152x768xf32>
    %c0_7 = arith.constant 0 : index
    %c0_8 = arith.constant 0 : index
    %51 = vector.load %arg5[%c0_7, %c0_8] : memref<152x768xf32, #tpu.memory_space<vmem>>, vector<152x768xf32>
    tpu.vector_store %arg5[%c0_7, %c0_8], %50 {strides = array<i32>} : memref<152x768xf32, #tpu.memory_space<vmem>>, vector<152x768xf32>,
    return
  }
  func.func @transform_0(%arg0: i32, %arg1: i32) -> i32 {
    %c0_i32 = arith.constant 0 : i32
    %c0_i32_0 = arith.constant 0 : i32
    return %c0_i32 : i32
  }
  func.func @transform_1(%arg0: i32, %arg1: i32) -> (i32, i32) {
    %c0_i32 = arith.constant 0 : i32
    %c0_i32_0 = arith.constant 0 : i32
    return %arg0, %c0_i32 : i32, i32
  }
  func.func @transform_2(%arg0: i32, %arg1: i32) -> (i32, i32) {
    %c0_i32 = arith.constant 0 : i32
    %c0_i32_0 = arith.constant 0 : i32
    return %c0_i32, %arg1 : i32, i32
  }
  func.func @transform_3(%arg0: i32, %arg1: i32) -> (i32, i32) {
    %c0_i32 = arith.constant 0 : i32
    return %arg0, %arg1 : i32, i32
  }
}

</mosaic_0001>

<bundles_post_ra>
// kernel: tpu_custom_call.1
= control target key start
LH: loop header
LB: loop body
LE: loop exit
PB: predicated region body
PF: predicated region fallthrough
CT: control target
= control target key end

     0   :  { %8 = vsyncpa [#allocation4], 0  ;;  %s2766_s0 = inlined_call_operand.vmem [shape: f32[12], index: 0, kind: input, shape index: {}]   ;;  %s2767_s1 = inlined_call_operand.vmem [shape: f32[300,1], index: 1, kind: input, shape index: {}]   ;;  %s2768_s2 = inlined_call_operand.vmem [shape: f32[1,700], index: 2, kind: input, shape index: {}]   ;;  %s2769_s3 = inlined_call_operand.hbm [shape: f32[300,700], index: 3, kind: output, shape index: {}]  }
   0x1   :  { %9 = vsyncpa [#allocation3], 0 }
   0x2   :  { %11 = vsyncpa [#allocation3 + $0x1], 0  ;;  %s1970_s12 = smov 0   ;;  %s1972_s13 = smov 0  }
   0x3   :  { %s1974_s14 = smov 0   ;;  %s1976_s15 = smov 0  }
   0x4   :  { %s1978_s16 = smov 0   ;;  %s1980_s17 = smov 0  }
   0x5 LB: > { %s1682_s18 = sadd.s32 4294967295, %s1940_s17   ;;  %s1683_s19 = sadd.s32 4294967294, %s1940_s17   ;;  %s1940_s17 = sphi %s1980_s17, %s17_s17   ;;  %s1936_s16 = sphi %s1978_s16, %s2778_s16   ;;  %s1932_s15 = sphi %s1976_s15, %s2777_s15   ;;  %s1928_s14 = sphi %s1974_s14, %s2776_s14   ;;  %s1924_s13 = sphi %s1972_s13, %s2775_s13   ;;  %s1920_s12 = sphi %s1970_s12, %s2774_s12  }
   0x6   : > { %s29_s20 = sadd.s32 1, %s1936_s16  ;;  %s111_s21 = sadd.s32 1, %s1928_s14 }
   0x7   : > { %p31_p0 = scmp.ge.s32.totalorder %s29_s20, 2  ;;  %p121_p1 = scmp.ne.s32.totalorder %s1928_s14, %s1924_s13 }
   0x8   : > { %p122_p2 = scmp.eq.s32.totalorder %s1682_s18, 1  ;;  %p127_p3 = scmp.ne.s32.totalorder %s1924_s13, %s1920_s12 }
   0x9   : > { %s2780_s20 = smov (%p31_p0, %s29_s20), 0  ;;  %p128_p5 = scmp.eq.s32.totalorder %s1683_s19, 1 }
   0xa   : > { %p2010_p4 = por %p122_p2, %p121_p1  ;;  %s106_s23 = ssub.s32 %s1936_s16, %s2780_s20 }
   0xb   : > { %p1684_p6 = scmp.ge.s32.totalorder %s1940_s17, 1  ;;  %p109_p7 = scmp.eq.s32.totalorder %s106_s23, 0 }
   0xc   : > { %p2017_p8 = por %p128_p5, %p127_p3  ;;  %p135_p9 = scmp.lt.s32.totalorder %s1940_s17, 3 }
   0xd   : > { %s2023_s25 = scalar_select %p109_p7, %s1928_s14, %s111_s21  }
   0xe   : > { %p2025_p10 = pnand %p1684_p6, %p135_p9  ;;  %p2029_p11 = scmp.eq.s32.totalorder %s1682_s18, 0 }
   0xf   : > { %s148_s30 = sshll.u32 %s2766_s0, 4  ;;  %s149_s30 = int_to_ptr.vmem [resolvable:$true] %s148_s30 }
  0x10   : > { %p1778_p12 = pneg %p2025_p10  ;;  %s1845_s4 = scalar_lea.vmem %s149_s30, 16 }
  0x11   : > { %p1846_p0 = scmp.ne.s32.totalorder %s149_s30, %s1845_s4  ;;  %p1853_p5 = scmp.lt.s32.totalorder %s149_s30, %s149_s30 }
  0x12   : > { %p1779_p13 = pnand %p2029_p11, %p1778_p12  ;;  %p1854_p6 = scmp.lt.s32.totalorder %s1845_s4, %s1845_s4 }
  0x14   : > { %p1847_p1 = pneg %p1779_p13  ;;  %p1855_p7 = por %p1854_p6, %p1853_p5 }
  0x16   : > { %p1848_p2 = pnand %p1847_p1, %p1846_p0 }
  0x18   : > { %p1849_p3 = pneg %p1848_p2 }
  0x1a   : > { %p1856_p9 = pnand %p1855_p7, %p1849_p3 }
  0x1c   : > { %1859 = shalt.err (!%p1856_p9)
}
  0x1d   : > { %s1942_s5 = smov [#allocation2]   ;;  %178 = sbr.rel (%p2025_p10) target bundleno = 562 (0x232), region = 32 }
  0x1e   : > { %1781 = dma.vmem_to_smem (!%p1779_p13), %s149_s30, 16, %s1942_s5, [#allocation4]  }
  0x22   : > { %1911 = dma.done.wait (%p2029_p11), [#allocation4], 16  }
  0x23   : > { %1913 = vsyncadd (%p2029_p11), [#allocation4], 4294967280 }
  0x24   : > { %184 = sfence }
  0x25   : > { %s207_s6 = smul.u32 19, %s1932_s15  ;;  %s1691_s7 = sld [smem:[#allocation2 + $0x2]]  ;;  %v1944_v5 = vmov 0.0   ;;  %v239_v6 = vld [vmem:[%s2768_s2] sm:$0x3f]  ;;  %v687_v8 = vlaneseq  ;;  %vm810_vm0 = vcmask 1040384  }
  0x26   : > { %s2052_s18 = sld [smem:[#allocation2 + $0x1]]  ;;  %s1943_s21 = smov 1   ;;  %981 = vmatprep.mubr.f32.mxu0 %v1944_v5  ;;  %1041 = vmatprep.mubr.f32.mxu1 %v1944_v5  ;;  %vm817_vm1 = vcmask 1041408   ;;  %vm824_vm2 = vcmask 1042432   ;;  %vm831_vm3 = vcmask 1043456   ;;  %vm838_vm4 = vcmask 1044480  }
  0x27   : > { %p208_p12 = scmp.lt.s32.totalorder %s207_s6, 37  ;;  %s2056_s19 = sld [smem:[#allocation2]]  ;;  %v2085_v12 = vshrl.u32 %v687_v8, 7  ;;  %vm845_vm5 = vcmask 1045504   ;;  %vm852_vm6 = vcmask 1046528   ;;  %vm546_vm7 = vcmask 7168  }
  0x28   : > { %s2060_s23 = sld [smem:[#allocation2 + $0x5]]  ;;  %s1945_s4 = smov 2   ;;  %vm586_vm8 = vcmask 23552   ;;  %vm566_vm9 = vcmask 15360   ;;  %vm606_vm10 = vcmask 31744   ;;  %vm626_vm11 = vcmask 39936  }
  0x29   : > { %s2782_s6 = smov (!%p208_p12, %s207_s6), 37  ;;  %s2063_s26 = sld [smem:[#allocation2 + $0x4]]  ;;  %v693_v20 = vsub.s32 1, %v2085_v12  ;;  %v689_v29 = vsub.s32 0, %v2085_v12  ;;  %vm646_vm12 = vcmask 48128   ;;  %vm666_vm13 = vcmask 56320  }
  0x2a   : > { %s1690_s8 = sshll.u32 %s2782_s6, 3  ;;  %s2067_s27 = sld [smem:[#allocation2 + $0x3]]  ;;  %vm859_vm14 = vcmask 64512  }
  0x2b   : > { %s2050_s11 = scalar_lea.vmem %s2767_s1, %s1690_s8  ;;  %v241_v7 = vstv %s1691_s7  ;;  %s2072_s30 = sld [smem:[#allocation2 + $0x8]] }
  0x2c   : > { %v221_v0 = vld [vmem:[%s2050_s11 + $0x8] sm:$0xff]  ;;  %v220_v1 = vld [vmem:[%s2050_s11] sm:$0xff]  ;;  %v230_v4 = vld [vmem:[%s2050_s11 + $0x50] sm:$0xff]  ;;  %s2076_s5 = sld [smem:[#allocation2 + $0x7]]  ;;  %v242_v10 = vmul.f32 %v241_v7, %v239_v6  ;;  %v244_v11 = vstv %s2052_s18  ;;  %s1946_s9 = smov 3  }
  0x2d   : > { %339 = vrot.lane.b32.xlu1 %v221_v0, %s1943_s21  ;;  %337 = vrot.lane.b32.xlu0 %v220_v1, %s1943_s21  ;;  %v281_v2 = vmul.f32 %v221_v0, %v221_v0  ;;  %v280_v3 = vmul.f32 %v220_v1, %v220_v1  ;;  %s2078_s6 = sld [smem:[#allocation2 + $0xb]]  ;;  %v290_v13 = vmul.f32 %v230_v4, %v230_v4  ;;  %v248_v18 = vstv %s2056_s19  ;;  %v222_v25 = vld [vmem:[%s2050_s11 + $0x10] sm:$0xff] }
  0x2e   : > { %s2080_s8 = sld [smem:[#allocation2 + $0xa]]  ;;  %v245_v15 = vadd.f32 %v244_v11, %v242_v10  ;;  %v251_v16 = vstv %s2060_s23  ;;  %v282_v36 = vmul.f32 %v222_v25, %v222_v25  ;;  %v231_v40 = vld [vmem:[%s2050_s11 + $0x58] sm:$0xff]  ;;  %v232_v8 = vld [vmem:[%s2050_s11 + $0x60] sm:$0xff] }
  0x2f   : > { %v299_v9 = vmul.f32 %v280_v3, %v220_v1  ;;  %s2083_s7 = sld [smem:[#allocation2 + $0x6]]  ;;  %v300_v14 = vmul.f32 %v281_v2, %v221_v0  ;;  %v254_v17 = vstv %s2063_s26  ;;  %v252_v19 = vmul.f32 %v251_v16, %v239_v6  ;;  %v223_v63 = vld [vmem:[%s2050_s11 + $0x18] sm:$0xff] }
  0x30   : > { %s2089_s10 = sld [smem:[#allocation2 + $0x9]]  ;;  %v309_v21 = vmul.f32 %v290_v13, %v230_v4  ;;  %v246_v22 = vmul.f32 %v245_v15, %v239_v6  ;;  %v258_v31 = vstv %s2067_s27  ;;  %v291_v49 = vmul.f32 %v231_v40, %v231_v40  ;;  %v233_v15 = vld [vmem:[%s2050_s11 + $0x68] sm:$0xff] }
  0x31   : > { %415 = vrot.lane.b32.xlu1 %v281_v2, %s1945_s4  ;;  %357 = vrot.lane.b32.xlu0 %v230_v4, %s1943_s21  ;;  %v261_v23 = vstv %s2072_s30  ;;  %v255_v26 = vadd.f32 %v254_v17, %v252_v19  ;;  %v301_v50 = vmul.f32 %v282_v36, %v222_v25  ;;  %v283_v7 = vmul.f32 %v223_v63, %v223_v63  ;;  %v225_v19 = vld [vmem:[%s2050_s11 + $0x28] sm:$0xff]  ;;  %s1947_s30 = smov [#allocation5]  }
  0x32   : > { %v264_v24 = vstv %s2076_s5  ;;  %v262_v27 = vmul.f32 %v261_v23, %v239_v6  ;;  %v2102_v30 = vadd.f32 %v248_v18, %v246_v22  ;;  %v310_v60 = vmul.f32 %v291_v49, %v231_v40 }
  0x33   : > { %v271_v28 = vstv %s2078_s6  ;;  %v256_v34 = vmul.f32 %v255_v26, %v239_v6  ;;  %v302_v10 = vmul.f32 %v283_v7, %v223_v63  ;;  %v293_v16 = vmul.f32 %v233_v15, %v233_v15 }
  0x34   : > { %v272_v32 = vmul.f32 %v271_v28, %v239_v6  ;;  %v274_v33 = vstv %s2080_s8  ;;  %v265_v35 = vadd.f32 %v264_v24, %v262_v27  ;;  %v694_v43 = vrot.slane %v2102_v30, %v693_v20  ;;  %v235_v27 = vld [vmem:[%s2050_s11 + $0x78] sm:$0xff] }
  0x35   : > { %413 = vrot.lane.b32.xlu0 %v280_v3, %s1945_s4  ;;  %489 = vrot.lane.b32.xlu1 %v299_v9, %s1946_s9  ;;  %v268_v37 = vstv %s2083_s7  ;;  %v2111_v41 = vadd.f32 %v258_v31, %v256_v34  ;;  %v690_v44 = vrot.slane %v2102_v30, %v689_v29  ;;  %v292_v9 = vmul.f32 %v232_v8, %v232_v8 }
  0x36   : > { %v275_v38 = vadd.f32 %v274_v33, %v272_v32  ;;  %v278_v39 = vstv %s2089_s10  ;;  %v266_v42 = vmul.f32 %v265_v35, %v239_v6  ;;  %v312_v18 = vmul.f32 %v293_v16, %v233_v15 }
  0x37   : > { %v725_v47 = vrot.slane %v2111_v41, %v693_v20  ;;  %v721_v48 = vrot.slane %v2111_v41, %v689_v29  ;;  %v311_v11 = vmul.f32 %v292_v9, %v232_v8  ;;  %v709_v28 = vsub.s32 5, %v2085_v12 }
  0x38   : > { %v276_v45 = vmul.f32 %v275_v38, %v239_v6  ;;  %v2115_v46 = vadd.f32 %v268_v37, %v266_v42  ;;  %v705_v32 = vsub.s32 4, %v2085_v12 }
  0x39   : > { %433 = vrot.lane.b32.xlu0 %v290_v13, %s1945_s4  ;;  %491 = vrot.lane.b32.xlu1 %v300_v14, %s1946_s9  ;;  %v812_v53 = vsel %vm810_vm0, %v694_v43, %v725_v47  ;;  %v811_v55 = vsel %vm810_vm0, %v690_v44, %v721_v48  ;;  %v224_v13 = vld [vmem:[%s2050_s11 + $0x20] sm:$0xff]  ;;  %v710_v33 = vrot.slane %v2102_v30, %v709_v28  ;;  %v227_v47 = vld [vmem:[%s2050_s11 + $0x38] sm:$0xff] }
  0x3a   : > { %v2121_v51 = vadd.f32 %v278_v39, %v276_v45  ;;  %v756_v52 = vrot.slane %v2115_v46, %v693_v20  ;;  %v752_v54 = vrot.slane %v2115_v46, %v689_v29  ;;  %v284_v14 = vmul.f32 %v224_v13, %v224_v13 }
  0x3b   : > { %v741_v34 = vrot.slane %v2111_v41, %v709_v28  ;;  %v772_v35 = vrot.slane %v2115_v46, %v709_v28  ;;  %v706_v37 = vrot.slane %v2102_v30, %v705_v32  ;;  %v737_v38 = vrot.slane %v2111_v41, %v705_v32 }
  0x3c   : > { %v787_v56 = vrot.slane %v2121_v51, %v693_v20  ;;  %v783_v57 = vrot.slane %v2121_v51, %v689_v29  ;;  %v819_v58 = vsel %vm817_vm1, %v812_v53, %v756_v52  ;;  %v818_v59 = vsel %vm817_vm1, %v811_v55, %v752_v54 }
  0x3d   : > { %509 = vrot.lane.b32.xlu0 %v309_v21, %s1946_s9  ;;  %341 = vrot.lane.b32.xlu1 %v222_v25, %s1943_s21  ;;  %v303_v17 = vmul.f32 %v284_v14, %v224_v13  ;;  %v285_v20 = vmul.f32 %v225_v19, %v225_v19  ;;  %v234_v21 = vld [vmem:[%s2050_s11 + $0x70] sm:$0xff]  ;;  %v295_v29 = vmul.f32 %v235_v27, %v235_v27  ;;  %v697_v52 = vsub.s32 2, %v2085_v12 }
  0x3e   : > { %v826_v61 = vsel %vm824_vm2, %v819_v58, %v787_v56  ;;  %v825_v62 = vsel %vm824_vm2, %v818_v59, %v783_v57  ;;  %v294_v22 = vmul.f32 %v234_v21, %v234_v21  ;;  %v226_v25 = vld [vmem:[%s2050_s11 + $0x30] sm:$0xff]  ;;  %v768_v39 = vrot.slane %v2115_v46, %v705_v32 }
  0x3f   : > { %v833_v0 = vsel %vm831_vm3, %v826_v61, 0.0  ;;  %v832_v1 = vsel %vm831_vm3, %v825_v62, 0.0  ;;  %v304_v23 = vmul.f32 %v285_v20, %v225_v19  ;;  %v286_v26 = vmul.f32 %v226_v25, %v226_v25 }
  0x40   : > { %v840_v2 = vsel %vm838_vm4, %v833_v0, 0.0  ;;  %v839_v3 = vsel %vm838_vm4, %v832_v1, 0.0  ;;  %v313_v24 = vmul.f32 %v294_v22, %v234_v21  ;;  %v816_v42 = vsel %vm810_vm0, %v710_v33, %v741_v34 }
  0x41   : > { %359 = vrot.lane.b32.xlu0 %v231_v40, %s1943_s21  ;;  %417 = vrot.lane.b32.xlu1 %v282_v36, %s1945_s4  ;;  %v847_v4 = vsel %vm845_vm5, %v840_v2, 0.0  ;;  %v846_v6 = vsel %vm845_vm5, %v839_v3, 0.0  ;;  %v305_v31 = vmul.f32 %v286_v26, %v226_v25  ;;  %v803_v36 = vrot.slane %v2121_v51, %v709_v28 }
  0x42   : > { %1702 = vmatprep.subr.msk.mxu0 %vm852_vm6, %v847_v4  ;;  %1768 = vmatprep.subr.msk.mxu1 %vm852_vm6, %v847_v4  ;;  %v799_v40 = vrot.slane %v2121_v51, %v705_v32  ;;  %v314_v43 = vmul.f32 %v295_v29, %v235_v27  ;;  %v823_v44 = vsel %vm817_vm1, %v816_v42, %v772_v35 }
  0x43   : > { %1703 = vmatpush1.msk.msra.mxu0 %vm852_vm6, %v846_v6  ;;  %1769 = vmatpush1.msk.msra.mxu1 %vm852_vm6, %v846_v6  ;;  %v815_v45 = vsel %vm810_vm0, %v706_v37, %v737_v38  ;;  %v830_v48 = vsel %vm824_vm2, %v823_v44, %v803_v36  ;;  %v287_v53 = vmul.f32 %v227_v47, %v227_v47 }
  0x44   : > { %v837_v54 = vsel %vm831_vm3, %v830_v48, 0.0  ;;  %v698_v2 = vrot.slane %v2102_v30, %v697_v52  ;;  %v729_v3 = vrot.slane %v2111_v41, %v697_v52  ;;  %v760_v6 = vrot.slane %v2115_v46, %v697_v52 }
  0x45   : > { %435 = vrot.lane.b32.xlu0 %v291_v49, %s1945_s4  ;;  %493 = vrot.lane.b32.xlu1 %v301_v50, %s1946_s9  ;;  %v822_v49 = vsel %vm817_vm1, %v815_v45, %v768_v39  ;;  %v701_v50 = vsub.s32 3, %v2085_v12  ;;  %v844_v56 = vsel %vm838_vm4, %v837_v54, 0.0 }
  0x46   : > { %v829_v55 = vsel %vm824_vm2, %v822_v49, %v799_v40 }
  0x47   : > { %v836_v57 = vsel %vm831_vm3, %v829_v55, 0.0  ;;  %v702_v58 = vrot.slane %v2102_v30, %v701_v50  ;;  %v733_v59 = vrot.slane %v2111_v41, %v701_v50  ;;  %v764_v61 = vrot.slane %v2115_v46, %v701_v50 }
  0x48   : > { %v843_v12 = vsel %vm838_vm4, %v836_v57, 0.0  ;;  %v795_v62 = vrot.slane %v2121_v51, %v701_v50 }
  0x49   : > { %511 = vrot.lane.b32.xlu0 %v310_v60, %s1946_s9  ;;  %343 = vrot.lane.b32.xlu1 %v223_v63, %s1943_s21  ;;  %v851_v60 = vsel %vm845_vm5, %v844_v56, 0.0  ;;  %v236_v63 = vld [vmem:[%s2050_s11 + $0x80] sm:$0xff]  ;;  %v2210_v0 = vsel %vm845_vm5, %v843_v12, 0.0  ;;  %v814_v1 = vsel %vm810_vm0, %v702_v58, %v733_v59 }
  0x4a   : > { %1744 = vmatprep.subr.msk.mxu0 %vm852_vm6, %v851_v60  ;;  %v821_v4 = vsel %vm817_vm1, %v814_v1, %v764_v61 }
  0x4d   : > { %361 = vrot.lane.b32.xlu0 %v232_v8, %s1943_s21  ;;  %419 = vrot.lane.b32.xlu1 %v283_v7, %s1945_s4  ;;  %v791_v7 = vrot.slane %v2121_v51, %v697_v52  ;;  %v828_v8 = vsel %vm824_vm2, %v821_v4, %v795_v62 }
  0x4e   : > { %v835_v30 = vsel %vm831_vm3, %v828_v8, 0.0 }
  0x4f   : > { %v842_v46 = vsel %vm838_vm4, %v835_v30, 0.0 }
  0x51   : > { %437 = vrot.lane.b32.xlu0 %v292_v9, %s1945_s4  ;;  %495 = vrot.lane.b32.xlu1 %v302_v10, %s1946_s9  ;;  %v813_v9 = vsel %vm810_vm0, %v698_v2, %v729_v3  ;;  %v296_v10 = vmul.f32 %v236_v63, %v236_v63 }
  0x52   : > { %v820_v41 = vsel %vm817_vm1, %v813_v9, %v760_v6 }
  0x53   : > { %v827_v51 = vsel %vm824_vm2, %v820_v41, %v791_v7 }
  0x55   : > { %513 = vrot.lane.b32.xlu0 %v311_v11, %s1946_s9  ;;  %345 = vrot.lane.b32.xlu1 %v224_v13, %s1943_s21  ;;  %v306_v11 = vmul.f32 %v287_v53, %v227_v47  ;;  %v849_v13 = vsel %vm845_vm5, %v842_v46, 0.0 }
  0x56   : > { %1723 = vmatprep.subr.msk.mxu1 %vm852_vm6, %v849_v13 }
  0x59   : > { %363 = vrot.lane.b32.xlu0 %v233_v15, %s1943_s21  ;;  %421 = vrot.lane.b32.xlu1 %v284_v14, %s1945_s4  ;;  %v834_v14 = vsel %vm831_vm3, %v827_v51, 0.0 }
  0x5a   : > { %v841_v15 = vsel %vm838_vm4, %v834_v14, 0.0 }
  0x5d   : > { %439 = vrot.lane.b32.xlu0 %v293_v16, %s1945_s4  ;;  %497 = vrot.lane.b32.xlu1 %v303_v17, %s1946_s9  ;;  %v315_v16 = vmul.f32 %v296_v10, %v236_v63  ;;  %v2233_v17 = vsel %vm845_vm5, %v841_v15, 0.0 }
  0x61   : > { %515 = vrot.lane.b32.xlu0 %v312_v18, %s1946_s9  ;;  %347 = vrot.lane.b32.xlu1 %v225_v19, %s1943_s21  ;;  %v228_v18 = vld [vmem:[%s2050_s11 + $0x40] sm:$0xff] }
  0x62   : > { %v288_v19 = vmul.f32 %v228_v18, %v228_v18 }
  0x65   : > { %365 = vrot.lane.b32.xlu0 %v234_v21, %s1943_s21  ;;  %423 = vrot.lane.b32.xlu1 %v285_v20, %s1945_s4  ;;  %v237_v20 = vld [vmem:[%s2050_s11 + $0x88] sm:$0xff] }
  0x66   : > { %v297_v21 = vmul.f32 %v237_v20, %v237_v20 }
  0x69   : > { %441 = vrot.lane.b32.xlu0 %v294_v22, %s1945_s4  ;;  %499 = vrot.lane.b32.xlu1 %v304_v23, %s1946_s9  ;;  %v307_v22 = vmul.f32 %v288_v19, %v228_v18  ;;  %v316_v23 = vmul.f32 %v297_v21, %v237_v20 }
  0x6d   : > { %517 = vrot.lane.b32.xlu0 %v313_v24, %s1946_s9  ;;  %349 = vrot.lane.b32.xlu1 %v226_v25, %s1943_s21  ;;  %v229_v24 = vld [vmem:[%s2050_s11 + $0x48] sm:$0xff] }
  0x6e   : > { %v289_v25 = vmul.f32 %v229_v24, %v229_v24 }
  0x70   : > { %v308_v28 = vmul.f32 %v289_v25, %v229_v24 }
  0x71   : > { %367 = vrot.lane.b32.xlu0 %v235_v27, %s1943_s21  ;;  %425 = vrot.lane.b32.xlu1 %v286_v26, %s1945_s4  ;;  %v238_v26 = vld [vmem:[%s2050_s11 + $0x90] sm:$0xff]  ;;  %s204_s11 = sand.u32 1, %s1924_s13  }
  0x72   : > { %v298_v27 = vmul.f32 %v238_v26, %v238_v26  ;;  %s1770_s18 = smul.u32 912, %s204_s11 }
  0x74   : > { %s2594_s19 = scalar_lea.vmem [#allocation5], %s1770_s18 }
  0x75   : > { %443 = vrot.lane.b32.xlu0 %v295_v29, %s1945_s4  ;;  %501 = vrot.lane.b32.xlu1 %v305_v31, %s1946_s9  ;;  %v317_v29 = vmul.f32 %v298_v27, %v238_v26  ;;  %s1585_s23 = sshll.u32 %s2594_s19, 4  ;;  %s2715_s23 = int_to_ptr.vmem [resolvable:$true] %s1585_s23 }
  0x76   : > { %s1860_s29 = scalar_lea.vmem %s2715_s23, 14592 }
  0x77   : > { %p1861_p10 = scmp.ne.s32.totalorder %s2715_s23, %s1860_s29 }
  0x79   : > { %519 = vrot.lane.b32.xlu0 %v314_v43, %s1946_s9  ;;  %351 = vrot.lane.b32.xlu1 %v227_v47, %s1943_s21  ;;  %p1862_p11 = pnand %p1861_p10, %p2010_p4 }
  0x7b   : > { %p1863_p13 = pneg %p1862_p11 }
  0x7d   : > { %369 = vrot.lane.b32.xlu0 %v236_v63, %s1943_s21  ;;  %427 = vrot.lane.b32.xlu1 %v287_v53, %s1945_s4 }
  0x81   : > { %445 = vrot.lane.b32.xlu0 %v296_v10, %s1945_s4  ;;  %503 = vrot.lane.b32.xlu1 %v306_v11, %s1946_s9 }
  0x85   : > { %521 = vrot.lane.b32.xlu0 %v315_v16, %s1946_s9  ;;  %353 = vrot.lane.b32.xlu1 %v228_v18, %s1943_s21 }
  0x89   : > { %371 = vrot.lane.b32.xlu0 %v237_v20, %s1943_s21  ;;  %429 = vrot.lane.b32.xlu1 %v288_v19, %s1945_s4 }
  0x8d   : > { %447 = vrot.lane.b32.xlu0 %v297_v21, %s1945_s4  ;;  %505 = vrot.lane.b32.xlu1 %v307_v22, %s1946_s9 }
  0x91   : > { %523 = vrot.lane.b32.xlu0 %v316_v23, %s1946_s9  ;;  %355 = vrot.lane.b32.xlu1 %v229_v24, %s1943_s21 }
  0x95   : > { %373 = vrot.lane.b32.xlu0 %v238_v26, %s1943_s21  ;;  %431 = vrot.lane.b32.xlu1 %v289_v25, %s1945_s4  ;;  %s1788_s21 = smul.u32 14592, %s1932_s15  ;;  %s2721_s15 = scalar_lea.sflag [#allocation3], %s204_s11 }
  0x97   : > { %s2713_s28 = scalar_lea.hbm %s2769_s3, %s1788_s21 }
  0x99   : > { %449 = vrot.lane.b32.xlu0 %v298_v27, %s1945_s4  ;;  %507 = vrot.lane.b32.xlu1 %v308_v28, %s1946_s9  ;;  %s1864_s4 = sshll.u32 %s1947_s30, 4  ;;  %s1865_s4 = int_to_ptr.vmem [resolvable:$false] %s1864_s4 }
  0x9a   : > { %s1866_s5 = scalar_lea.vmem %s1865_s4, 29184  ;;  %p1867_p0 = scmp.lt.s32.totalorder %s2715_s23, %s1865_s4 }
  0x9b   : > { %p1868_p1 = scmp.lt.s32.totalorder %s1866_s5, %s1860_s29 }
  0x9d   : > { %525 = vrot.lane.b32.xlu0 %v317_v29, %s1946_s9  ;;  %p1869_p2 = por %p1868_p1, %p1867_p0 }
  0x9f   : > { %v340_v31 = vpop.permute.xlu1 %339  ;;  %v338_v32 = vpop.permute.xlu0 %337  ;;  %p1870_p3 = pnand %p1869_p2, %p1863_p13 }
  0xa0   : > { %v547_v35 = vsel %vm546_vm7, 1.0, %v338_v32  ;;  %v548_v38 = vsel %vm546_vm7, 1.0, %v340_v31 }
  0xa3   : > { %v416_v33 = vpop.permute.xlu1 %415  ;;  %v358_v34 = vpop.permute.xlu0 %357 }
  0xa4   : > { %v568_v43 = vsel %vm566_vm9, %v548_v38, %v416_v33  ;;  %v557_v53 = vsel %vm546_vm7, 1.0, %v358_v34 }
  0xa7   : > { %v414_v36 = vpop.permute.xlu0 %413  ;;  %v490_v37 = vpop.permute.xlu1 %489 }
  0xa8   : > { %v567_v39 = vsel %vm566_vm9, %v547_v35, %v414_v36 }
  0xa9   : > { %v587_v40 = vsel %vm586_vm8, %v567_v39, %v490_v37 }
  0xaa   : > { %v607_v42 = vsel %vm606_vm10, %v587_v40, 0.0 }
  0xab   : > { %v627_v44 = vsel %vm626_vm11, %v607_v42, 0.0  ;;  %v434_v45 = vpop.permute.xlu0 %433  ;;  %v492_v47 = vpop.permute.xlu1 %491 }
  0xac   : > { %v588_v48 = vsel %vm586_vm8, %v568_v43, %v492_v47  ;;  %v647_v49 = vsel %vm646_vm12, %v627_v44, 0.0  ;;  %v577_v55 = vsel %vm566_vm9, %v557_v53, %v434_v45 }
  0xad   : > { %v608_v50 = vsel %vm606_vm10, %v588_v48, 0.0  ;;  %v2263_v52 = vsel %vm666_vm13, %v647_v49, 0.0 }
  0xae   : > { %v628_v54 = vsel %vm626_vm11, %v608_v50, 0.0  ;;  %1704 = vmatmul.mubr.msk.f32.vlgmr.msra.gmra.mxu0 %vm859_vm14, %v2263_v52 }
  0xaf   : > { %v510_v56 = vpop.permute.xlu0 %509  ;;  %v342_v57 = vpop.permute.xlu1 %341  ;;  %987 = vmatprep.mubr.f32.mxu0 %v1944_v5  ;;  %v648_v58 = vsel %vm646_vm12, %v628_v54, 0.0  ;;  %1745 = vmatpush1.msk.msra.mxu0 %vm852_vm6, %v2210_v0 }
  0xb0   : > { %v597_v59 = vsel %vm586_vm8, %v577_v55, %v510_v56  ;;  %v2276_v60 = vsel %vm666_vm13, %v648_v58, 0.0  ;;  %v549_v0 = vsel %vm546_vm7, 1.0, %v342_v57 }
  0xb1   : > { %v617_v12 = vsel %vm606_vm10, %v597_v59, 0.0 }
  0xb2   : > { %v637_v61 = vsel %vm626_vm11, %v617_v12, 0.0  ;;  %1705 = vmatmul.mubr.msk.f32.gmra.mxu0 %vm859_vm14, %v2276_v60 }
  0xb3   : > { %v360_v62 = vpop.permute.xlu0 %359  ;;  %v418_v63 = vpop.permute.xlu1 %417  ;;  %v657_v1 = vsel %vm646_vm12, %v637_v61, 0.0  ;;  %993 = vmatprep.mubr.f32.mxu0 %v1944_v5 }
  0xb4   : > { %v2286_v2 = vsel %vm666_vm13, %v657_v1, 0.0  ;;  %v569_v3 = vsel %vm566_vm9, %v549_v0, %v418_v63  ;;  %v558_v9 = vsel %vm546_vm7, 1.0, %v360_v62 }
  0xb5   : > { %1714 = vmatmul.mubr.msk.f32.vlgmr.msra.gmra.mxu1 %vm859_vm14, %v2286_v2 }
  0xb6   : > { %1047 = vmatprep.mubr.f32.mxu1 %v1944_v5  ;;  %1724 = vmatpush1.msk.msra.mxu1 %vm852_vm6, %v2233_v17 }
  0xb7   : > { %v436_v4 = vpop.permute.xlu0 %435  ;;  %v494_v6 = vpop.permute.xlu1 %493 }
  0xb8   : > { %v589_v7 = vsel %vm586_vm8, %v569_v3, %v494_v6  ;;  %v578_v11 = vsel %vm566_vm9, %v558_v9, %v436_v4 }
  0xb9   : > { %v609_v8 = vsel %vm606_vm10, %v589_v7, 0.0 }
  0xba   : > { %v629_v10 = vsel %vm626_vm11, %v609_v8, 0.0 }
  0xbb   : > { %v512_v30 = vpop.permute.xlu0 %511  ;;  %v344_v41 = vpop.permute.xlu1 %343  ;;  %v649_v46 = vsel %vm646_vm12, %v629_v10, 0.0 }
  0xbc   : > { %v598_v51 = vsel %vm586_vm8, %v578_v11, %v512_v30  ;;  %v2302_v13 = vsel %vm666_vm13, %v649_v46, 0.0  ;;  %v550_v19 = vsel %vm546_vm7, 1.0, %v344_v41 }
  0xbd   : > { %v618_v14 = vsel %vm606_vm10, %v598_v51, 0.0  ;;  %1706 = vmatmul.mubr.msk.f32.gmra.mxu0 %vm859_vm14, %v2302_v13 }
  0xbe   : > { %v638_v15 = vsel %vm626_vm11, %v618_v14, 0.0  ;;  %999 = vmatprep.mubr.f32.mxu0 %v1944_v5 }
  0xbf   : > { %v362_v16 = vpop.permute.xlu0 %361  ;;  %v420_v17 = vpop.permute.xlu1 %419  ;;  %v658_v18 = vsel %vm646_vm12, %v638_v15, 0.0 }
  0xc0   : > { %v2312_v20 = vsel %vm666_vm13, %v658_v18, 0.0  ;;  %v570_v21 = vsel %vm566_vm9, %v550_v19, %v420_v17  ;;  %v559_v26 = vsel %vm546_vm7, 1.0, %v362_v16 }
  0xc1   : > { %1715 = vmatmul.mubr.msk.f32.gmra.mxu1 %vm859_vm14, %v2312_v20 }
  0xc2   : > { %1053 = vmatprep.mubr.f32.mxu1 %v1944_v5 }
  0xc3   : > { %v438_v22 = vpop.permute.xlu0 %437  ;;  %v496_v23 = vpop.permute.xlu1 %495 }
  0xc4   : > { %v590_v24 = vsel %vm586_vm8, %v570_v21, %v496_v23  ;;  %v579_v28 = vsel %vm566_vm9, %v559_v26, %v438_v22 }
  0xc5   : > { %v610_v25 = vsel %vm606_vm10, %v590_v24, 0.0 }
  0xc6   : > { %v630_v27 = vsel %vm626_vm11, %v610_v25, 0.0 }
  0xc7   : > { %v514_v29 = vpop.permute.xlu0 %513  ;;  %v346_v31 = vpop.permute.xlu1 %345  ;;  %v650_v32 = vsel %vm646_vm12, %v630_v27, 0.0 }
  0xc8   : > { %v599_v33 = vsel %vm586_vm8, %v579_v28, %v514_v29  ;;  %v2326_v34 = vsel %vm666_vm13, %v650_v32, 0.0  ;;  %v551_v40 = vsel %vm546_vm7, 1.0, %v346_v31 }
  0xc9   : > { %v619_v35 = vsel %vm606_vm10, %v599_v33, 0.0  ;;  %1707 = vmatmul.mubr.msk.f32.gmra.mxu0 %vm859_vm14, %v2326_v34 }
  0xca   : > { %v639_v36 = vsel %vm626_vm11, %v619_v35, 0.0  ;;  %1005 = vmatprep.mubr.f32.mxu0 %v1944_v5 }
  0xcb   : > { %v364_v37 = vpop.permute.xlu0 %363  ;;  %v422_v38 = vpop.permute.xlu1 %421  ;;  %v659_v39 = vsel %vm646_vm12, %v639_v36, 0.0 }
  0xcc   : > { %v2336_v42 = vsel %vm666_vm13, %v659_v39, 0.0  ;;  %v571_v43 = vsel %vm566_vm9, %v551_v40, %v422_v38  ;;  %v560_v49 = vsel %vm546_vm7, 1.0, %v364_v37 }
  0xcd   : > { %1716 = vmatmul.mubr.msk.f32.gmra.mxu1 %vm859_vm14, %v2336_v42 }
  0xce   : > { %1059 = vmatprep.mubr.f32.mxu1 %v1944_v5 }
  0xcf   : > { %v440_v44 = vpop.permute.xlu0 %439  ;;  %v498_v45 = vpop.permute.xlu1 %497 }
  0xd0   : > { %v591_v47 = vsel %vm586_vm8, %v571_v43, %v498_v45  ;;  %v580_v53 = vsel %vm566_vm9, %v560_v49, %v440_v44 }
  0xd1   : > { %v611_v48 = vsel %vm606_vm10, %v591_v47, 0.0 }
  0xd2   : > { %v631_v50 = vsel %vm626_vm11, %v611_v48, 0.0 }
  0xd3   : > { %v516_v54 = vpop.permute.xlu0 %515  ;;  %v348_v55 = vpop.permute.xlu1 %347  ;;  %v651_v56 = vsel %vm646_vm12, %v631_v50, 0.0 }
  0xd4   : > { %v600_v57 = vsel %vm586_vm8, %v580_v53, %v516_v54  ;;  %v2350_v58 = vsel %vm666_vm13, %v651_v56, 0.0  ;;  %v552_v1 = vsel %vm546_vm7, 1.0, %v348_v55 }
  0xd5   : > { %v620_v59 = vsel %vm606_vm10, %v600_v57, 0.0  ;;  %1708 = vmatmul.mubr.msk.f32.gmra.mxu0 %vm859_vm14, %v2350_v58 }
  0xd6   : > { %v640_v12 = vsel %vm626_vm11, %v620_v59, 0.0  ;;  %1011 = vmatprep.mubr.f32.mxu0 %v1944_v5 }
  0xd7   : > { %v366_v61 = vpop.permute.xlu0 %365  ;;  %v424_v62 = vpop.permute.xlu1 %423  ;;  %v660_v63 = vsel %vm646_vm12, %v640_v12, 0.0 }
  0xd8   : > { %v2360_v0 = vsel %vm666_vm13, %v660_v63, 0.0  ;;  %v572_v3 = vsel %vm566_vm9, %v552_v1, %v424_v62  ;;  %v561_v9 = vsel %vm546_vm7, 1.0, %v366_v61 }
  0xd9   : > { %1717 = vmatmul.mubr.msk.f32.gmra.mxu1 %vm859_vm14, %v2360_v0 }
  0xda   : > { %1065 = vmatprep.mubr.f32.mxu1 %v1944_v5 }
  0xdb   : > { %v442_v4 = vpop.permute.xlu0 %441  ;;  %v500_v6 = vpop.permute.xlu1 %499 }
  0xdc   : > { %v592_v7 = vsel %vm586_vm8, %v572_v3, %v500_v6  ;;  %v581_v11 = vsel %vm566_vm9, %v561_v9, %v442_v4 }
  0xdd   : > { %v612_v8 = vsel %vm606_vm10, %v592_v7, 0.0 }
  0xde   : > { %v632_v10 = vsel %vm626_vm11, %v612_v8, 0.0 }
  0xdf   : > { %v518_v30 = vpop.permute.xlu0 %517  ;;  %v350_v41 = vpop.permute.xlu1 %349  ;;  %v652_v46 = vsel %vm646_vm12, %v632_v10, 0.0 }
  0xe0   : > { %v601_v51 = vsel %vm586_vm8, %v581_v11, %v518_v30  ;;  %v2374_v14 = vsel %vm666_vm13, %v652_v46, 0.0  ;;  %v553_v21 = vsel %vm546_vm7, 1.0, %v350_v41 }
  0xe1   : > { %v621_v15 = vsel %vm606_vm10, %v601_v51, 0.0  ;;  %1709 = vmatmul.mubr.msk.f32.gmra.mxu0 %vm859_vm14, %v2374_v14 }
  0xe2   : > { %v641_v16 = vsel %vm626_vm11, %v621_v15, 0.0  ;;  %1017 = vmatprep.mubr.f32.mxu0 %v1944_v5 }
  0xe3   : > { %v368_v17 = vpop.permute.xlu0 %367  ;;  %v426_v18 = vpop.permute.xlu1 %425  ;;  %v661_v19 = vsel %vm646_vm12, %v641_v16, 0.0 }
  0xe4   : > { %v2384_v22 = vsel %vm666_vm13, %v661_v19, 0.0  ;;  %v573_v23 = vsel %vm566_vm9, %v553_v21, %v426_v18  ;;  %v562_v28 = vsel %vm546_vm7, 1.0, %v368_v17 }
  0xe5   : > { %1718 = vmatmul.mubr.msk.f32.gmra.mxu1 %vm859_vm14, %v2384_v22 }
  0xe6   : > { %1071 = vmatprep.mubr.f32.mxu1 %v1944_v5 }
  0xe7   : > { %v444_v24 = vpop.permute.xlu0 %443  ;;  %v502_v25 = vpop.permute.xlu1 %501 }
  0xe8   : > { %v593_v26 = vsel %vm586_vm8, %v573_v23, %v502_v25  ;;  %v582_v31 = vsel %vm566_vm9, %v562_v28, %v444_v24 }
  0xe9   : > { %v613_v27 = vsel %vm606_vm10, %v593_v26, 0.0 }
  0xea   : > { %v633_v29 = vsel %vm626_vm11, %v613_v27, 0.0 }
  0xeb   : > { %v520_v32 = vpop.permute.xlu0 %519  ;;  %v352_v33 = vpop.permute.xlu1 %351  ;;  %v653_v35 = vsel %vm646_vm12, %v633_v29, 0.0 }
  0xec   : > { %v602_v36 = vsel %vm586_vm8, %v582_v31, %v520_v32  ;;  %v2398_v37 = vsel %vm666_vm13, %v653_v35, 0.0  ;;  %v554_v45 = vsel %vm546_vm7, 1.0, %v352_v33 }
  0xed   : > { %v622_v38 = vsel %vm606_vm10, %v602_v36, 0.0  ;;  %1710 = vmatmul.mubr.msk.f32.gmra.mxu0 %vm859_vm14, %v2398_v37 }
  0xee   : > { %v642_v39 = vsel %vm626_vm11, %v622_v38, 0.0  ;;  %1023 = vmatprep.mubr.f32.mxu0 %v1944_v5 }
  0xef   : > { %v370_v40 = vpop.permute.xlu0 %369  ;;  %v428_v43 = vpop.permute.xlu1 %427  ;;  %v662_v44 = vsel %vm646_vm12, %v642_v39, 0.0 }
  0xf0   : > { %v2408_v47 = vsel %vm666_vm13, %v662_v44, 0.0  ;;  %v574_v48 = vsel %vm566_vm9, %v554_v45, %v428_v43  ;;  %v563_v55 = vsel %vm546_vm7, 1.0, %v370_v40 }
  0xf1   : > { %1719 = vmatmul.mubr.msk.f32.gmra.mxu1 %vm859_vm14, %v2408_v47 }
  0xf2   : > { %1077 = vmatprep.mubr.f32.mxu1 %v1944_v5 }
  0xf3   : > { %v446_v49 = vpop.permute.xlu0 %445  ;;  %v504_v50 = vpop.permute.xlu1 %503 }
  0xf4   : > { %v594_v53 = vsel %vm586_vm8, %v574_v48, %v504_v50  ;;  %v583_v57 = vsel %vm566_vm9, %v563_v55, %v446_v49 }
  0xf5   : > { %v614_v54 = vsel %vm606_vm10, %v594_v53, 0.0 }
  0xf6   : > { %v634_v56 = vsel %vm626_vm11, %v614_v54, 0.0 }
  0xf7   : > { %v522_v59 = vpop.permute.xlu0 %521  ;;  %v354_v12 = vpop.permute.xlu1 %353  ;;  %v654_v61 = vsel %vm646_vm12, %v634_v56, 0.0 }
  0xf8   : > { %v603_v62 = vsel %vm586_vm8, %v583_v57, %v522_v59  ;;  %v2422_v63 = vsel %vm666_vm13, %v654_v61, 0.0  ;;  %v555_v8 = vsel %vm546_vm7, 1.0, %v354_v12 }
  0xf9   : > { %v623_v1 = vsel %vm606_vm10, %v603_v62, 0.0  ;;  %1711 = vmatmul.mubr.msk.f32.gmra.mxu0 %vm859_vm14, %v2422_v63 }
  0xfa   : > { %v643_v3 = vsel %vm626_vm11, %v623_v1, 0.0  ;;  %1029 = vmatprep.mubr.f32.mxu0 %v1944_v5 }
  0xfb   : > { %v372_v4 = vpop.permute.xlu0 %371  ;;  %v430_v6 = vpop.permute.xlu1 %429  ;;  %v663_v7 = vsel %vm646_vm12, %v643_v3, 0.0 }
  0xfc   : > { %v2432_v9 = vsel %vm666_vm13, %v663_v7, 0.0  ;;  %v575_v10 = vsel %vm566_vm9, %v555_v8, %v430_v6  ;;  %v564_v51 = vsel %vm546_vm7, 1.0, %v372_v4 }
  0xfd   : > { %1720 = vmatmul.mubr.msk.f32.gmra.mxu1 %vm859_vm14, %v2432_v9 }
  0xfe   : > { %1083 = vmatprep.mubr.f32.mxu1 %v1944_v5 }
  0xff   : > { %v448_v11 = vpop.permute.xlu0 %447  ;;  %v506_v30 = vpop.permute.xlu1 %505 }
 0x100   : > { %v595_v41 = vsel %vm586_vm8, %v575_v10, %v506_v30  ;;  %v584_v16 = vsel %vm566_vm9, %v564_v51, %v448_v11 }
 0x101   : > { %v615_v46 = vsel %vm606_vm10, %v595_v41, 0.0 }
 0x102   : > { %v635_v15 = vsel %vm626_vm11, %v615_v46, 0.0 }
 0x103   : > { %v524_v17 = vpop.permute.xlu0 %523  ;;  %v356_v18 = vpop.permute.xlu1 %355  ;;  %v655_v19 = vsel %vm646_vm12, %v635_v15, 0.0 }
 0x104   : > { %v604_v21 = vsel %vm586_vm8, %v584_v16, %v524_v17  ;;  %v2446_v23 = vsel %vm666_vm13, %v655_v19, 0.0  ;;  %v556_v29 = vsel %vm546_vm7, 1.0, %v356_v18 }
 0x105   : > { %v624_v24 = vsel %vm606_vm10, %v604_v21, 0.0  ;;  %1712 = vmatmul.mubr.msk.f32.gmra.mxu0 %vm859_vm14, %v2446_v23 }
 0x106   : > { %v644_v25 = vsel %vm626_vm11, %v624_v24, 0.0  ;;  %1035 = vmatprep.mubr.f32.mxu0 %v1944_v5 }
 0x107   : > { %v374_v26 = vpop.permute.xlu0 %373  ;;  %v432_v27 = vpop.permute.xlu1 %431  ;;  %v664_v28 = vsel %vm646_vm12, %v644_v25, 0.0 }
 0x108   : > { %v2456_v31 = vsel %vm666_vm13, %v664_v28, 0.0  ;;  %v576_v32 = vsel %vm566_vm9, %v556_v29, %v432_v27  ;;  %v565_v39 = vsel %vm546_vm7, 1.0, %v374_v26 }
 0x109   : > { %1721 = vmatmul.mubr.msk.f32.gmra.mxu1 %vm859_vm14, %v2456_v31 }
 0x10a   : > { %1089 = vmatprep.mubr.f32.mxu1 %v1944_v5 }
 0x10b   : > { %v450_v33 = vpop.permute.xlu0 %449  ;;  %v508_v35 = vpop.permute.xlu1 %507 }
 0x10c   : > { %v596_v36 = vsel %vm586_vm8, %v576_v32, %v508_v35  ;;  %v585_v43 = vsel %vm566_vm9, %v565_v39, %v450_v33 }
 0x10d   : > { %v616_v38 = vsel %vm606_vm10, %v596_v36, 0.0 }
 0x10e   : > { %v636_v40 = vsel %vm626_vm11, %v616_v38, 0.0 }
 0x10f   : > { %v526_v44 = vpop.permute.xlu0 %525  ;;  %v656_v45 = vsel %vm646_vm12, %v636_v40, 0.0 }
 0x110   : > { %v605_v48 = vsel %vm586_vm8, %v585_v43, %v526_v44  ;;  %v676_v49 = vsel %vm666_vm13, %v656_v45, 0.0 }
 0x111   : > { %v625_v50 = vsel %vm606_vm10, %v605_v48, 0.0  ;;  %1713 = vmatmul.mubr.msk.f32.gmra.mxu0 %vm859_vm14, %v676_v49 }
 0x112   : > { %v645_v53 = vsel %vm626_vm11, %v625_v50, 0.0  ;;  %1339 = vmatprep.mubr.f32.mxu0 %v1944_v5 }
 0x113   : > { %v665_v54 = vsel %vm646_vm12, %v645_v53, 0.0 }
 0x114   : > { %v2476_v55 = vsel %vm666_vm13, %v665_v54, 0.0 }
 0x115   : > { %1722 = vmatmul.mubr.msk.f32.gmra.mxu1 %vm859_vm14, %v2476_v55  ;;  %1746 = vmatmul.mubr.msk.f32.vlgmr.msra.gmra.mxu0 %vm859_vm14, %v2263_v52 }
 0x116   : > { %1160 = vmatprep.mubr.f32.mxu1 %v1944_v5  ;;  %1345 = vmatprep.mubr.f32.mxu0 %v1944_v5 }
 0x119   : > { %1725 = vmatmul.mubr.msk.f32.vlgmr.msra.gmra.mxu1 %vm859_vm14, %v2263_v52  ;;  %1747 = vmatmul.mubr.msk.f32.gmra.mxu0 %vm859_vm14, %v2276_v60 }
 0x11a   : > { %1166 = vmatprep.mubr.f32.mxu1 %v1944_v5  ;;  %1351 = vmatprep.mubr.f32.mxu0 %v1944_v5 }
 0x11d   : > { %1726 = vmatmul.mubr.msk.f32.gmra.mxu1 %vm859_vm14, %v2276_v60  ;;  %1748 = vmatmul.mubr.msk.f32.gmra.mxu0 %vm859_vm14, %v2302_v13 }
 0x11e   : > { %1172 = vmatprep.mubr.f32.mxu1 %v1944_v5  ;;  %1357 = vmatprep.mubr.f32.mxu0 %v1944_v5 }
 0x121   : > { %1727 = vmatmul.mubr.msk.f32.gmra.mxu1 %vm859_vm14, %v2302_v13  ;;  %1749 = vmatmul.mubr.msk.f32.gmra.mxu0 %vm859_vm14, %v2326_v34 }
 0x122   : > { %1178 = vmatprep.mubr.f32.mxu1 %v1944_v5  ;;  %1363 = vmatprep.mubr.f32.mxu0 %v1944_v5 }
 0x125   : > { %1728 = vmatmul.mubr.msk.f32.gmra.mxu1 %vm859_vm14, %v2326_v34  ;;  %1750 = vmatmul.mubr.msk.f32.gmra.mxu0 %vm859_vm14, %v2350_v58 }
 0x126   : > { %1184 = vmatprep.mubr.f32.mxu1 %v1944_v5  ;;  %1369 = vmatprep.mubr.f32.mxu0 %v1944_v5 }
 0x129   : > { %1729 = vmatmul.mubr.msk.f32.gmra.mxu1 %vm859_vm14, %v2350_v58  ;;  %1751 = vmatmul.mubr.msk.f32.gmra.mxu0 %vm859_vm14, %v2374_v14 }
 0x12a   : > { %1190 = vmatprep.mubr.f32.mxu1 %v1944_v5  ;;  %1375 = vmatprep.mubr.f32.mxu0 %v1944_v5 }
 0x12d   : > { %1730 = vmatmul.mubr.msk.f32.gmra.mxu1 %vm859_vm14, %v2374_v14  ;;  %1752 = vmatmul.mubr.msk.f32.gmra.mxu0 %vm859_vm14, %v2398_v37 }
 0x12e   : > { %1196 = vmatprep.mubr.f32.mxu1 %v1944_v5  ;;  %1381 = vmatprep.mubr.f32.mxu0 %v1944_v5 }
 0x131   : > { %1731 = vmatmul.mubr.msk.f32.gmra.mxu1 %vm859_vm14, %v2398_v37  ;;  %1753 = vmatmul.mubr.msk.f32.gmra.mxu0 %vm859_vm14, %v2422_v63 }
 0x132   : > { %1202 = vmatprep.mubr.f32.mxu1 %v1944_v5  ;;  %1387 = vmatprep.mubr.f32.mxu0 %v1944_v5 }
 0x135   : > { %1732 = vmatmul.mubr.msk.f32.gmra.mxu1 %vm859_vm14, %v2422_v63  ;;  %1754 = vmatmul.mubr.msk.f32.gmra.mxu0 %vm859_vm14, %v2446_v23 }
 0x136   : > { %1208 = vmatprep.mubr.f32.mxu1 %v1944_v5  ;;  %1393 = vmatprep.mubr.f32.mxu0 %v1944_v5 }
 0x139   : > { %1733 = vmatmul.mubr.msk.f32.gmra.mxu1 %vm859_vm14, %v2446_v23  ;;  %1755 = vmatmul.mubr.msk.f32.gmra.mxu0 %vm859_vm14, %v676_v49 }
 0x13a   : > { %1214 = vmatprep.mubr.f32.mxu1 %v1944_v5  ;;  %1399 = vmatprep.mubr.f32.mxu0 %v1944_v5 }
 0x13d   : > { %1734 = vmatmul.mubr.msk.f32.gmra.mxu1 %vm859_vm14, %v676_v49  ;;  %1756 = vmatmul.mubr.msk.f32.gmra.mxu0 %vm859_vm14, %v2286_v2 }
 0x13e   : > { %1220 = vmatprep.mubr.f32.mxu1 %v1944_v5  ;;  %1405 = vmatprep.mubr.f32.mxu0 %v1944_v5 }
 0x141   : > { %1735 = vmatmul.mubr.msk.f32.gmra.mxu1 %vm859_vm14, %v2286_v2  ;;  %1757 = vmatmul.mubr.msk.f32.gmra.mxu0 %vm859_vm14, %v2312_v20 }
 0x142   : > { %1226 = vmatprep.mubr.f32.mxu1 %v1944_v5  ;;  %1411 = vmatprep.mubr.f32.mxu0 %v1944_v5 }
 0x145   : > { %1736 = vmatmul.mubr.msk.f32.gmra.mxu1 %vm859_vm14, %v2312_v20  ;;  %1758 = vmatmul.mubr.msk.f32.gmra.mxu0 %vm859_vm14, %v2336_v42 }
 0x146   : > { %1232 = vmatprep.mubr.f32.mxu1 %v1944_v5  ;;  %1417 = vmatprep.mubr.f32.mxu0 %v1944_v5 }
 0x149   : > { %1737 = vmatmul.mubr.msk.f32.gmra.mxu1 %vm859_vm14, %v2336_v42  ;;  %1759 = vmatmul.mubr.msk.f32.gmra.mxu0 %vm859_vm14, %v2360_v0 }
 0x14a   : > { %1238 = vmatprep.mubr.f32.mxu1 %v1944_v5  ;;  %1423 = vmatprep.mubr.f32.mxu0 %v1944_v5 }
 0x14d   : > { %1738 = vmatmul.mubr.msk.f32.gmra.mxu1 %vm859_vm14, %v2360_v0  ;;  %1760 = vmatmul.mubr.msk.f32.gmra.mxu0 %vm859_vm14, %v2384_v22 }
 0x14e   : > { %1244 = vmatprep.mubr.f32.mxu1 %v1944_v5  ;;  %1429 = vmatprep.mubr.f32.mxu0 %v1944_v5 }
 0x151   : > { %1739 = vmatmul.mubr.msk.f32.gmra.mxu1 %vm859_vm14, %v2384_v22  ;;  %1761 = vmatmul.mubr.msk.f32.gmra.mxu0 %vm859_vm14, %v2408_v47 }
 0x152   : > { %1250 = vmatprep.mubr.f32.mxu1 %v1944_v5  ;;  %1435 = vmatprep.mubr.f32.mxu0 %v1944_v5 }
 0x155   : > { %1740 = vmatmul.mubr.msk.f32.gmra.mxu1 %vm859_vm14, %v2408_v47  ;;  %1762 = vmatmul.mubr.msk.f32.gmra.mxu0 %vm859_vm14, %v2432_v9 }
 0x156   : > { %1256 = vmatprep.mubr.f32.mxu1 %v1944_v5  ;;  %1441 = vmatprep.mubr.f32.mxu0 %v1944_v5 }
 0x159   : > { %1741 = vmatmul.mubr.msk.f32.gmra.mxu1 %vm859_vm14, %v2432_v9  ;;  %1763 = vmatmul.mubr.msk.f32.gmra.mxu0 %vm859_vm14, %v2456_v31 }
 0x15a   : > { %1262 = vmatprep.mubr.f32.mxu1 %v1944_v5  ;;  %1447 = vmatprep.mubr.f32.mxu0 %v1944_v5 }
 0x15d   : > { %1742 = vmatmul.mubr.msk.f32.gmra.mxu1 %vm859_vm14, %v2456_v31  ;;  %1764 = vmatmul.mubr.msk.f32.gmra.mxu0 %vm859_vm14, %v2476_v55 }
 0x15e   : > { %1268 = vmatprep.mubr.f32.mxu1 %v1944_v5 }
 0x161   : > { %1743 = vmatmul.mubr.msk.f32.gmra.mxu1 %vm859_vm14, %v2476_v55 }
 0x16e   : > { %v983_v52 = vpop.f32.mrf.mxu0 }
 0x16f   : > { %1454 = vst [vmem:[%s2594_s19] sm:$0xff] %v983_v52 }
 0x170   : > { %v985_v5 = vpop.f32.mrf.mxu0 }
 0x171   : > { %1455 = vst [vmem:[%s2594_s19 + $0x8] sm:$0xff] %v985_v5 }
 0x172   : > { %v989_v60 = vpop.f32.mrf.mxu0 }
 0x173   : > { %1460 = vst [vmem:[%s2594_s19 + $0x30] sm:$0xff] %v989_v60 }
 0x174   : > { %v991_v2 = vpop.f32.mrf.mxu0 }
 0x175   : > { %1461 = vst [vmem:[%s2594_s19 + $0x38] sm:$0xff] %v991_v2  ;;  %v1043_v13 = vpop.f32.mrf.mxu1 }
 0x176   : > { %1514 = vst [vmem:[%s2594_s19 + $0x1e0] sm:$0xff] %v1043_v13 }
 0x177   : > { %v1045_v20 = vpop.f32.mrf.mxu1 }
 0x178   : > { %1515 = vst [vmem:[%s2594_s19 + $0x1e8] sm:$0xff] %v1045_v20 }
 0x17d   : > { %v995_v34 = vpop.f32.mrf.mxu0 }
 0x17e   : > { %1466 = vst [vmem:[%s2594_s19 + $0x60] sm:$0xff] %v995_v34 }
 0x17f   : > { %v997_v42 = vpop.f32.mrf.mxu0 }
 0x180   : > { %1467 = vst [vmem:[%s2594_s19 + $0x68] sm:$0xff] %v997_v42 }
 0x181   : > { %v1049_v58 = vpop.f32.mrf.mxu1 }
 0x182   : > { %1520 = vst [vmem:[%s2594_s19 + $0x210] sm:$0xff] %v1049_v58 }
 0x183   : > { %v1051_v0 = vpop.f32.mrf.mxu1 }
 0x184   : > { %1521 = vst [vmem:[%s2594_s19 + $0x218] sm:$0xff] %v1051_v0 }
 0x189   : > { %v1001_v14 = vpop.f32.mrf.mxu0 }
 0x18a   : > { %1472 = vst [vmem:[%s2594_s19 + $0x90] sm:$0xff] %v1001_v14 }
 0x18b   : > { %v1003_v22 = vpop.f32.mrf.mxu0 }
 0x18c   : > { %1473 = vst [vmem:[%s2594_s19 + $0x98] sm:$0xff] %v1003_v22 }
 0x18d   : > { %v1055_v37 = vpop.f32.mrf.mxu1 }
 0x18e   : > { %1526 = vst [vmem:[%s2594_s19 + $0x240] sm:$0xff] %v1055_v37 }
 0x18f   : > { %v1057_v47 = vpop.f32.mrf.mxu1 }
 0x190   : > { %1527 = vst [vmem:[%s2594_s19 + $0x248] sm:$0xff] %v1057_v47 }
 0x195   : > { %v1007_v56 = vpop.f32.mrf.mxu0 }
 0x196   : > { %1478 = vst [vmem:[%s2594_s19 + $0xc0] sm:$0xff] %v1007_v56 }
 0x197   : > { %v1009_v57 = vpop.f32.mrf.mxu0 }
 0x198   : > { %1479 = vst [vmem:[%s2594_s19 + $0xc8] sm:$0xff] %v1009_v57 }
 0x199   : > { %v1061_v59 = vpop.f32.mrf.mxu1 }
 0x19a   : > { %1532 = vst [vmem:[%s2594_s19 + $0x270] sm:$0xff] %v1061_v59 }
 0x19b   : > { %v1063_v12 = vpop.f32.mrf.mxu1 }
 0x19c   : > { %1533 = vst [vmem:[%s2594_s19 + $0x278] sm:$0xff] %v1063_v12 }
 0x1a1   : > { %v1013_v61 = vpop.f32.mrf.mxu0 }
 0x1a2   : > { %1484 = vst [vmem:[%s2594_s19 + $0xf0] sm:$0xff] %v1013_v61 }
 0x1a3   : > { %v1015_v62 = vpop.f32.mrf.mxu0 }
 0x1a4   : > { %1485 = vst [vmem:[%s2594_s19 + $0xf8] sm:$0xff] %v1015_v62 }
 0x1a5   : > { %v1067_v63 = vpop.f32.mrf.mxu1 }
 0x1a6   : > { %1538 = vst [vmem:[%s2594_s19 + $0x2a0] sm:$0xff] %v1067_v63 }
 0x1a7   : > { %v1069_v1 = vpop.f32.mrf.mxu1 }
 0x1a8   : > { %1539 = vst [vmem:[%s2594_s19 + $0x2a8] sm:$0xff] %v1069_v1 }
 0x1ad   : > { %v1019_v3 = vpop.f32.mrf.mxu0 }
 0x1ae   : > { %1490 = vst [vmem:[%s2594_s19 + $0x120] sm:$0xff] %v1019_v3 }
 0x1af   : > { %v1021_v4 = vpop.f32.mrf.mxu0 }
 0x1b0   : > { %1491 = vst [vmem:[%s2594_s19 + $0x128] sm:$0xff] %v1021_v4 }
 0x1b1   : > { %v1073_v6 = vpop.f32.mrf.mxu1 }
 0x1b2   : > { %1544 = vst [vmem:[%s2594_s19 + $0x2d0] sm:$0xff] %v1073_v6 }
 0x1b3   : > { %v1075_v7 = vpop.f32.mrf.mxu1 }
 0x1b4   : > { %1545 = vst [vmem:[%s2594_s19 + $0x2d8] sm:$0xff] %v1075_v7 }
 0x1b9   : > { %v1025_v8 = vpop.f32.mrf.mxu0 }
 0x1ba   : > { %1496 = vst [vmem:[%s2594_s19 + $0x150] sm:$0xff] %v1025_v8 }
 0x1bb   : > { %v1027_v9 = vpop.f32.mrf.mxu0 }
 0x1bc   : > { %1497 = vst [vmem:[%s2594_s19 + $0x158] sm:$0xff] %v1027_v9 }
 0x1bd   : > { %v1079_v10 = vpop.f32.mrf.mxu1 }
 0x1be   : > { %1550 = vst [vmem:[%s2594_s19 + $0x300] sm:$0xff] %v1079_v10 }
 0x1bf   : > { %v1081_v11 = vpop.f32.mrf.mxu1 }
 0x1c0   : > { %1551 = vst [vmem:[%s2594_s19 + $0x308] sm:$0xff] %v1081_v11 }
 0x1c5   : > { %v1031_v30 = vpop.f32.mrf.mxu0 }
 0x1c6   : > { %1502 = vst [vmem:[%s2594_s19 + $0x180] sm:$0xff] %v1031_v30 }
 0x1c7   : > { %v1033_v41 = vpop.f32.mrf.mxu0 }
 0x1c8   : > { %1503 = vst [vmem:[%s2594_s19 + $0x188] sm:$0xff] %v1033_v41 }
 0x1c9   : > { %v1085_v46 = vpop.f32.mrf.mxu1 }
 0x1ca   : > { %1556 = vst [vmem:[%s2594_s19 + $0x330] sm:$0xff] %v1085_v46 }
 0x1cb   : > { %v1087_v51 = vpop.f32.mrf.mxu1 }
 0x1cc   : > { %1557 = vst [vmem:[%s2594_s19 + $0x338] sm:$0xff] %v1087_v51 }
 0x1d1   : > { %v1037_v15 = vpop.f32.mrf.mxu0 }
 0x1d2   : > { %1508 = vst [vmem:[%s2594_s19 + $0x1b0] sm:$0xff] %v1037_v15 }
 0x1d3   : > { %v1039_v16 = vpop.f32.mrf.mxu0 }
 0x1d4   : > { %1509 = vst [vmem:[%s2594_s19 + $0x1b8] sm:$0xff] %v1039_v16 }
 0x1d5   : > { %v1091_v17 = vpop.f32.mrf.mxu1  ;;  %v1341_v18 = vpop.f32.mrf.mxu0 }
 0x1d6   : > { %1562 = vst [vmem:[%s2594_s19 + $0x360] sm:$0xff] %v1091_v17  ;;  %1458 = vst [vmem:[%s2594_s19 + $0x20] sm:$0xff] %v1341_v18 }
 0x1d7   : > { %v1093_v19 = vpop.f32.mrf.mxu1  ;;  %v1343_v21 = vpop.f32.mrf.mxu0 }
 0x1d8   : > { %1563 = vst [vmem:[%s2594_s19 + $0x368] sm:$0xff] %v1093_v19  ;;  %1459 = vst [vmem:[%s2594_s19 + $0x28] sm:$0xff] %v1343_v21 }
 0x1d9   : > { %v1162_v23 = vpop.f32.mrf.mxu1  ;;  %v1347_v24 = vpop.f32.mrf.mxu0 }
 0x1da   : > { %1456 = vst [vmem:[%s2594_s19 + $0x10] sm:$0xff] %v1162_v23  ;;  %1464 = vst [vmem:[%s2594_s19 + $0x50] sm:$0xff] %v1347_v24 }
 0x1db   : > { %v1164_v25 = vpop.f32.mrf.mxu1  ;;  %v1349_v26 = vpop.f32.mrf.mxu0 }
 0x1dc   : > { %1457 = vst [vmem:[%s2594_s19 + $0x18] sm:$0xff] %v1164_v25  ;;  %1465 = vst [vmem:[%s2594_s19 + $0x58] sm:$0xff] %v1349_v26 }
 0x1dd   : > { %v1168_v27 = vpop.f32.mrf.mxu1  ;;  %v1353_v28 = vpop.f32.mrf.mxu0 }
 0x1de   : > { %1462 = vst [vmem:[%s2594_s19 + $0x40] sm:$0xff] %v1168_v27  ;;  %1470 = vst [vmem:[%s2594_s19 + $0x80] sm:$0xff] %v1353_v28 }
 0x1df   : > { %v1170_v29 = vpop.f32.mrf.mxu1  ;;  %v1355_v31 = vpop.f32.mrf.mxu0 }
 0x1e0   : > { %1463 = vst [vmem:[%s2594_s19 + $0x48] sm:$0xff] %v1170_v29  ;;  %1471 = vst [vmem:[%s2594_s19 + $0x88] sm:$0xff] %v1355_v31 }
 0x1e1   : > { %v1174_v32 = vpop.f32.mrf.mxu1  ;;  %v1359_v33 = vpop.f32.mrf.mxu0 }
 0x1e2   : > { %1468 = vst [vmem:[%s2594_s19 + $0x70] sm:$0xff] %v1174_v32  ;;  %1476 = vst [vmem:[%s2594_s19 + $0xb0] sm:$0xff] %v1359_v33 }
 0x1e3   : > { %v1176_v35 = vpop.f32.mrf.mxu1  ;;  %v1361_v36 = vpop.f32.mrf.mxu0 }
 0x1e4   : > { %1469 = vst [vmem:[%s2594_s19 + $0x78] sm:$0xff] %v1176_v35  ;;  %1477 = vst [vmem:[%s2594_s19 + $0xb8] sm:$0xff] %v1361_v36 }
 0x1e5   : > { %v1180_v38 = vpop.f32.mrf.mxu1  ;;  %v1365_v39 = vpop.f32.mrf.mxu0 }
 0x1e6   : > { %1474 = vst [vmem:[%s2594_s19 + $0xa0] sm:$0xff] %v1180_v38  ;;  %1482 = vst [vmem:[%s2594_s19 + $0xe0] sm:$0xff] %v1365_v39 }
 0x1e7   : > { %v1182_v40 = vpop.f32.mrf.mxu1  ;;  %v1367_v43 = vpop.f32.mrf.mxu0 }
 0x1e8   : > { %1475 = vst [vmem:[%s2594_s19 + $0xa8] sm:$0xff] %v1182_v40  ;;  %1483 = vst [vmem:[%s2594_s19 + $0xe8] sm:$0xff] %v1367_v43 }
 0x1e9   : > { %v1186_v44 = vpop.f32.mrf.mxu1  ;;  %v1371_v45 = vpop.f32.mrf.mxu0 }
 0x1ea   : > { %1480 = vst [vmem:[%s2594_s19 + $0xd0] sm:$0xff] %v1186_v44  ;;  %1488 = vst [vmem:[%s2594_s19 + $0x110] sm:$0xff] %v1371_v45 }
 0x1eb   : > { %v1188_v48 = vpop.f32.mrf.mxu1  ;;  %v1373_v49 = vpop.f32.mrf.mxu0 }
 0x1ec   : > { %1481 = vst [vmem:[%s2594_s19 + $0xd8] sm:$0xff] %v1188_v48  ;;  %1489 = vst [vmem:[%s2594_s19 + $0x118] sm:$0xff] %v1373_v49 }
 0x1ed   : > { %v1192_v50 = vpop.f32.mrf.mxu1  ;;  %v1377_v53 = vpop.f32.mrf.mxu0 }
 0x1ee   : > { %1486 = vst [vmem:[%s2594_s19 + $0x100] sm:$0xff] %v1192_v50  ;;  %1494 = vst [vmem:[%s2594_s19 + $0x140] sm:$0xff] %v1377_v53 }
 0x1ef   : > { %v1194_v54 = vpop.f32.mrf.mxu1  ;;  %v1379_v55 = vpop.f32.mrf.mxu0 }
 0x1f0   : > { %1487 = vst [vmem:[%s2594_s19 + $0x108] sm:$0xff] %v1194_v54  ;;  %1495 = vst [vmem:[%s2594_s19 + $0x148] sm:$0xff] %v1379_v55 }
 0x1f1   : > { %v1198_v52 = vpop.f32.mrf.mxu1  ;;  %v1383_v5 = vpop.f32.mrf.mxu0 }
 0x1f2   : > { %1492 = vst [vmem:[%s2594_s19 + $0x130] sm:$0xff] %v1198_v52  ;;  %1500 = vst [vmem:[%s2594_s19 + $0x170] sm:$0xff] %v1383_v5 }
 0x1f3   : > { %v1200_v60 = vpop.f32.mrf.mxu1  ;;  %v1385_v2 = vpop.f32.mrf.mxu0 }
 0x1f4   : > { %1493 = vst [vmem:[%s2594_s19 + $0x138] sm:$0xff] %v1200_v60  ;;  %1501 = vst [vmem:[%s2594_s19 + $0x178] sm:$0xff] %v1385_v2 }
 0x1f5   : > { %v1204_v13 = vpop.f32.mrf.mxu1  ;;  %v1389_v20 = vpop.f32.mrf.mxu0 }
 0x1f6   : > { %1498 = vst [vmem:[%s2594_s19 + $0x160] sm:$0xff] %v1204_v13  ;;  %1506 = vst [vmem:[%s2594_s19 + $0x1a0] sm:$0xff] %v1389_v20 }
 0x1f7   : > { %v1206_v34 = vpop.f32.mrf.mxu1  ;;  %v1391_v42 = vpop.f32.mrf.mxu0 }
 0x1f8   : > { %1499 = vst [vmem:[%s2594_s19 + $0x168] sm:$0xff] %v1206_v34  ;;  %1507 = vst [vmem:[%s2594_s19 + $0x1a8] sm:$0xff] %v1391_v42 }
 0x1f9   : > { %v1210_v58 = vpop.f32.mrf.mxu1  ;;  %v1395_v0 = vpop.f32.mrf.mxu0 }
 0x1fa   : > { %1504 = vst [vmem:[%s2594_s19 + $0x190] sm:$0xff] %v1210_v58  ;;  %1512 = vst [vmem:[%s2594_s19 + $0x1d0] sm:$0xff] %v1395_v0 }
 0x1fb   : > { %v1212_v14 = vpop.f32.mrf.mxu1  ;;  %v1397_v22 = vpop.f32.mrf.mxu0 }
 0x1fc   : > { %1505 = vst [vmem:[%s2594_s19 + $0x198] sm:$0xff] %v1212_v14  ;;  %1513 = vst [vmem:[%s2594_s19 + $0x1d8] sm:$0xff] %v1397_v22 }
 0x1fd   : > { %v1216_v37 = vpop.f32.mrf.mxu1  ;;  %v1401_v47 = vpop.f32.mrf.mxu0 }
 0x1fe   : > { %1510 = vst [vmem:[%s2594_s19 + $0x1c0] sm:$0xff] %v1216_v37  ;;  %1518 = vst [vmem:[%s2594_s19 + $0x200] sm:$0xff] %v1401_v47 }
 0x1ff   : > { %v1218_v56 = vpop.f32.mrf.mxu1  ;;  %v1403_v57 = vpop.f32.mrf.mxu0 }
 0x200   : > { %1511 = vst [vmem:[%s2594_s19 + $0x1c8] sm:$0xff] %v1218_v56  ;;  %1519 = vst [vmem:[%s2594_s19 + $0x208] sm:$0xff] %v1403_v57 }
 0x201   : > { %v1222_v59 = vpop.f32.mrf.mxu1  ;;  %v1407_v12 = vpop.f32.mrf.mxu0 }
 0x202   : > { %1516 = vst [vmem:[%s2594_s19 + $0x1f0] sm:$0xff] %v1222_v59  ;;  %1524 = vst [vmem:[%s2594_s19 + $0x230] sm:$0xff] %v1407_v12 }
 0x203   : > { %v1224_v61 = vpop.f32.mrf.mxu1  ;;  %v1409_v62 = vpop.f32.mrf.mxu0 }
 0x204   : > { %1517 = vst [vmem:[%s2594_s19 + $0x1f8] sm:$0xff] %v1224_v61  ;;  %1525 = vst [vmem:[%s2594_s19 + $0x238] sm:$0xff] %v1409_v62 }
 0x205   : > { %v1228_v63 = vpop.f32.mrf.mxu1  ;;  %v1413_v1 = vpop.f32.mrf.mxu0 }
 0x206   : > { %1522 = vst [vmem:[%s2594_s19 + $0x220] sm:$0xff] %v1228_v63  ;;  %1530 = vst [vmem:[%s2594_s19 + $0x260] sm:$0xff] %v1413_v1 }
 0x207   : > { %v1230_v3 = vpop.f32.mrf.mxu1  ;;  %v1415_v4 = vpop.f32.mrf.mxu0 }
 0x208   : > { %1523 = vst [vmem:[%s2594_s19 + $0x228] sm:$0xff] %v1230_v3  ;;  %1531 = vst [vmem:[%s2594_s19 + $0x268] sm:$0xff] %v1415_v4 }
 0x209   : > { %v1234_v6 = vpop.f32.mrf.mxu1  ;;  %v1419_v7 = vpop.f32.mrf.mxu0 }
 0x20a   : > { %1528 = vst [vmem:[%s2594_s19 + $0x250] sm:$0xff] %v1234_v6  ;;  %1536 = vst [vmem:[%s2594_s19 + $0x290] sm:$0xff] %v1419_v7 }
 0x20b   : > { %v1236_v8 = vpop.f32.mrf.mxu1  ;;  %v1421_v9 = vpop.f32.mrf.mxu0 }
 0x20c   : > { %1529 = vst [vmem:[%s2594_s19 + $0x258] sm:$0xff] %v1236_v8  ;;  %1537 = vst [vmem:[%s2594_s19 + $0x298] sm:$0xff] %v1421_v9 }
 0x20d   : > { %v1240_v10 = vpop.f32.mrf.mxu1  ;;  %v1425_v11 = vpop.f32.mrf.mxu0 }
 0x20e   : > { %1534 = vst [vmem:[%s2594_s19 + $0x280] sm:$0xff] %v1240_v10  ;;  %1542 = vst [vmem:[%s2594_s19 + $0x2c0] sm:$0xff] %v1425_v11 }
 0x20f   : > { %v1242_v30 = vpop.f32.mrf.mxu1  ;;  %v1427_v41 = vpop.f32.mrf.mxu0 }
 0x210   : > { %1535 = vst [vmem:[%s2594_s19 + $0x288] sm:$0xff] %v1242_v30  ;;  %1543 = vst [vmem:[%s2594_s19 + $0x2c8] sm:$0xff] %v1427_v41 }
 0x211   : > { %v1246_v46 = vpop.f32.mrf.mxu1  ;;  %v1431_v51 = vpop.f32.mrf.mxu0 }
 0x212   : > { %1540 = vst [vmem:[%s2594_s19 + $0x2b0] sm:$0xff] %v1246_v46  ;;  %1548 = vst [vmem:[%s2594_s19 + $0x2f0] sm:$0xff] %v1431_v51 }
 0x213   : > { %v1248_v15 = vpop.f32.mrf.mxu1  ;;  %v1433_v16 = vpop.f32.mrf.mxu0 }
 0x214   : > { %1541 = vst [vmem:[%s2594_s19 + $0x2b8] sm:$0xff] %v1248_v15  ;;  %1549 = vst [vmem:[%s2594_s19 + $0x2f8] sm:$0xff] %v1433_v16 }
 0x215   : > { %v1252_v17 = vpop.f32.mrf.mxu1  ;;  %v1437_v18 = vpop.f32.mrf.mxu0 }
 0x216   : > { %1546 = vst [vmem:[%s2594_s19 + $0x2e0] sm:$0xff] %v1252_v17  ;;  %1554 = vst [vmem:[%s2594_s19 + $0x320] sm:$0xff] %v1437_v18 }
 0x217   : > { %v1254_v19 = vpop.f32.mrf.mxu1  ;;  %v1439_v21 = vpop.f32.mrf.mxu0 }
 0x218   : > { %1547 = vst [vmem:[%s2594_s19 + $0x2e8] sm:$0xff] %v1254_v19  ;;  %1555 = vst [vmem:[%s2594_s19 + $0x328] sm:$0xff] %v1439_v21 }
 0x219   : > { %v1258_v23 = vpop.f32.mrf.mxu1  ;;  %v1443_v24 = vpop.f32.mrf.mxu0 }
 0x21a   : > { %1552 = vst [vmem:[%s2594_s19 + $0x310] sm:$0xff] %v1258_v23  ;;  %1560 = vst [vmem:[%s2594_s19 + $0x350] sm:$0xff] %v1443_v24 }
 0x21b   : > { %v1260_v25 = vpop.f32.mrf.mxu1  ;;  %v1445_v26 = vpop.f32.mrf.mxu0 }
 0x21c   : > { %1553 = vst [vmem:[%s2594_s19 + $0x318] sm:$0xff] %v1260_v25  ;;  %1561 = vst [vmem:[%s2594_s19 + $0x358] sm:$0xff] %v1445_v26 }
 0x21d   : > { %v1264_v27 = vpop.f32.mrf.mxu1  ;;  %v1449_v28 = vpop.f32.mrf.mxu0 }
 0x21e   : > { %1558 = vst [vmem:[%s2594_s19 + $0x340] sm:$0xff] %v1264_v27  ;;  %1566 = vst [vmem:[%s2594_s19 + $0x380] sm:$0xff] %v1449_v28 }
 0x21f   : > { %v1266_v29 = vpop.f32.mrf.mxu1  ;;  %v1451_v31 = vpop.f32.mrf.mxu0 }
 0x220   : > { %1559 = vst [vmem:[%s2594_s19 + $0x348] sm:$0xff] %v1266_v29  ;;  %1567 = vst [vmem:[%s2594_s19 + $0x388] sm:$0xff] %v1451_v31 }
 0x221   : > { %v1270_v32 = vpop.f32.mrf.mxu1 }
 0x222   : > { %1564 = vst [vmem:[%s2594_s19 + $0x370] sm:$0xff] %v1270_v32 }
 0x223   : > { %v1272_v33 = vpop.f32.mrf.mxu1 }
 0x224   : > { %1565 = vst [vmem:[%s2594_s19 + $0x378] sm:$0xff] %v1272_v33 }
 0x225   : > { %1873 = shalt.err (!%p1870_p3)
}
 0x226   : > { %s1874_s6 = scalar_lea.hbm %s2713_s28, 14592  ;;  %s1878_s9 = scalar_lea.hbm %s2769_s3, 29184 }
 0x227   : > { %p1875_p5 = scmp.ne.s32.totalorder %s2713_s28, %s1874_s6  ;;  %p1879_p9 = scmp.lt.s32.totalorder %s2713_s28, %s2769_s3 }
 0x228   : > { %p1880_p12 = scmp.lt.s32.totalorder %s1878_s9, %s1874_s6 }
 0x229   : > { %p1876_p6 = pnand %p1875_p5, %p2010_p4 }
 0x22a   : > { %p1881_p10 = por %p1880_p12, %p1879_p9 }
 0x22b   : > { %p1877_p7 = pneg %p1876_p6 }
 0x22d   : > { %p1882_p11 = pnand %p1881_p10, %p1877_p7 }
 0x22f   : > { %1885 = shalt.err (!%p1882_p11)
}
 0x230   : > { %s1948_s18 = smov 768   ;;  %s1949_s19 = smov 48  }
 0x231   : > { %1776 = dma.vmem_to_hbm [thread:$0]  (%p2010_p4), %s2715_s23, 14592, %s2713_s28, %s2721_s15, %s1948_s18, %s1948_s18, %s1949_s19  }
 0x232 PF: > { %p1789_p13 = scmp.ge.s32.totalorder %s1940_s17, 2  ;;  %s1600_s21 = sand.u32 1, %s1920_s12  }
 0x233   : > { %s1601_s26 = scalar_lea.sflag [#allocation3], %s1600_s21 }
 0x234   : > { %p1783_p0 = pnand %p1789_p13, %p2017_p8 }
 0x236   : > { %p1784_p1 = pneg %p1783_p0 }
 0x238   : > { %1915 = dma.done.wait (%p1784_p1), %s1601_s26, 14592  }
 0x239   : > { %1917 = vsyncadd (%p1784_p1), %s1601_s26, 4294952704  ;;  %s17_s17 = sadd.s32 1, %s1940_s17   ;;  %s2774_s12 = smov %s1924_s13 }
 0x23a   : > { %p14_p2 = scmp.ge.s32.totalorder %s17_s17, 4   ;;  %s2775_s13 = smov %s1928_s14 }
 0x23b   : > { %s2776_s14 = smov %s2023_s25  ;;  %s2777_s15 = smov %s1936_s16 }
 0x23c   : > { %s2778_s16 = smov %s2780_s20  ;;  %16 = sbr.rel (!%p14_p2) target bundleno = 5 (0x5), region = 75 }
 0x241   :  { %1606 = vsyncpa [#allocation3], 1 }
 0x242   :  { %1608 = vsyncpa [#allocation3 + $0x1], 1 }
 0x243   :  { %1609 = vsyncpa [#allocation4], 1 }
 0x244   :  { %1611 = vsyncpa [#allocation4 + $0x1], 1 }

</bundles_post_ra>
